<compile_context>
chip_gen: v7x
topology: tpu7x:2x2x1
jax: 0.10.0
libtpu: 0.0.40
codegen_flags: <defaults>
</compile_context>

<pallas_src>
import functools

import jax
import jax.numpy as jnp
import numpy as np
from jax.experimental import pallas as pl
from jax.experimental.pallas import tpu as pltpu


def _round_up(x, m):
    return (x + m - 1) // m * m


# ----------------------------------------------------------------------------
# Pallas kernels
# ----------------------------------------------------------------------------
def _input_proj_kernel(x_ref, wih_ref, b_ref, gx_ref):
    """gates_x = bf16(x_emb) @ bf16(W_ih^T) + (b_ih + b_hh), f32 accumulation."""
    acc = jnp.dot(x_ref[...].astype(jnp.bfloat16), wih_ref[...],
                  preferred_element_type=jnp.float32)
    gx_ref[...] = (acc + b_ref[...]).astype(gx_ref.dtype)


def _lstm_kernel(gx_ref, whh_ref, h0_ref, c0_ref,
                 o_ref, hn_ref, cn_ref,
                 h_sc, c_sc, *, hidden, chunk, seq_len, unroll):
    """Time-chunked LSTM recurrence.

    gx_ref : (chunk, Bp, 4H) precomputed input gates for this time chunk
    whh_ref: (H, 4H) recurrent weight (transposed, f32)
    h/c state carried across grid steps in VMEM scratch (f32).
    """
    ci = pl.program_id(0)

    @pl.when(ci == 0)
    def _():
        h_sc[...] = h0_ref[...].astype(jnp.float32)
        c_sc[...] = c0_ref[...].astype(jnp.float32)

    # Static: do we need to mask padded timesteps in the last chunk?
    needs_mask = (seq_len % chunk) != 0

    def step(i, carry):
        gates = gx_ref[i] + jnp.dot(h_sc[...], whh_ref[...],
                                    preferred_element_type=jnp.float32)
        i_g = jax.nn.sigmoid(gates[:, 0 * hidden:1 * hidden])
        f_g = jax.nn.sigmoid(gates[:, 1 * hidden:2 * hidden])
        g_g = jnp.tanh(gates[:, 2 * hidden:3 * hidden])
        o_g = jax.nn.sigmoid(gates[:, 3 * hidden:4 * hidden])
        c_new = f_g * c_sc[...] + i_g * g_g
        h_new = o_g * jnp.tanh(c_new)
        if needs_mask:
            valid = (ci * chunk + i) < seq_len
            c_sc[...] = jnp.where(valid, c_new, c_sc[...])
            h_sc[...] = jnp.where(valid, h_new, h_sc[...])
        else:
            c_sc[...] = c_new
            h_sc[...] = h_new
        o_ref[i] = h_new.astype(o_ref.dtype)
        return carry

    # Partial unroll: keeps LLO scheduling visibility without blowing vregs
    # when chunk is large.
    jax.lax.fori_loop(0, chunk, step, 0, unroll=unroll)

    @pl.when(ci == pl.num_programs(0) - 1)
    def _():
        hn_ref[...] = h_sc[...].astype(hn_ref.dtype)
        cn_ref[...] = c_sc[...].astype(cn_ref.dtype)


def _decoder_kernel(o_ref, w_ref, b_ref, out_ref):
    """Batched-over-rows linear (bf16 MXU, f32 acc) + stable log_softmax."""
    logits = (jnp.dot(o_ref[...].astype(jnp.bfloat16), w_ref[...],
                      preferred_element_type=jnp.float32)
              + b_ref[...])                                  # [Mt, V] f32
    m = jnp.max(logits, axis=-1, keepdims=True)
    z = logits - m
    lse = jnp.log(jnp.sum(jnp.exp(z), axis=-1, keepdims=True))
    out_ref[...] = (z - lse).astype(out_ref.dtype)
    # TODO(synk): for large vocabularies, tile V with an online logsumexp
    # (running max + running sum in VMEM scratch) instead of full-V blocks.


# ----------------------------------------------------------------------------
# Wrappers
# ----------------------------------------------------------------------------
def _pick_row_tile(n_rows, max_tile):
    return max_tile if n_rows >= max_tile else _round_up(n_rows, 8)


def input_projection(x_emb_me, w_ih_t_bf16, bias_4h, *, max_tile=512):
    """(M, E) @ (E, 4H) + bias, M-tiled 'parallel' Pallas call (bf16 MXU)."""
    M, E = x_emb_me.shape
    G = w_ih_t_bf16.shape[-1]
    mt = _pick_row_tile(M, max_tile)
    m_pad = _round_up(M, mt)
    if m_pad != M:
        x_emb_me = jnp.pad(x_emb_me, ((0, m_pad - M), (0, 0)))
    gx = pl.pallas_call(
        _input_proj_kernel,
        out_shape=jax.ShapeDtypeStruct((m_pad, G), jnp.float32),
        grid_spec=pltpu.PrefetchScalarGridSpec(
            num_scalar_prefetch=0,
            grid=(m_pad // mt,),
            in_specs=[
                pl.BlockSpec((mt, E), lambda i: (i, 0)),
                pl.BlockSpec((E, G), lambda i: (0, 0)),
                pl.BlockSpec((1, G), lambda i: (0, 0)),
            ],
            out_specs=pl.BlockSpec((mt, G), lambda i: (i, 0)),
        ),
        compiler_params=pltpu.CompilerParams(
            dimension_semantics=("parallel",)),
    )(x_emb_me, w_ih_t_bf16, bias_4h)
    return gx[:M]


def lstm_forward(gates_x_tbg, w_hh_h4h, h0_bh, c0_bh, *, hidden, chunk=64):
    """Chunked-time LSTM recurrence over precomputed input gates."""
    T, B, G = gates_x_tbg.shape
    H = hidden

    # Pad batch to a full sublane count (8 for f32) -> unmasked stores,
    # dense vreg use in every per-timestep slab.
    Bp = _round_up(B, 8)
    if Bp != B:
        gates_x_tbg = jnp.pad(gates_x_tbg, ((0, 0), (0, Bp - B), (0, 0)))
        h0_bh = jnp.pad(h0_bh, ((0, Bp - B), (0, 0)))
        c0_bh = jnp.pad(c0_bh, ((0, Bp - B), (0, 0)))

    tc = min(chunk, T)
    t_pad = _round_up(T, tc)
    if t_pad != T:
        gates_x_tbg = jnp.pad(gates_x_tbg,
                              ((0, t_pad - T), (0, 0), (0, 0)))

    unroll = tc if tc <= 8 else 8
    kernel = functools.partial(_lstm_kernel, hidden=H, chunk=tc,
                               seq_len=T, unroll=unroll)
    out_shapes = (
        jax.ShapeDtypeStruct((t_pad, Bp, H), jnp.float32),  # o, time-major
        jax.ShapeDtypeStruct((Bp, H), jnp.float32),          # h_n
        jax.ShapeDtypeStruct((Bp, H), jnp.float32),          # c_n
    )
    grid_spec = pltpu.PrefetchScalarGridSpec(
        num_scalar_prefetch=0,
        grid=(t_pad // tc,),
        in_specs=[
            pl.BlockSpec((tc, Bp, G), lambda c: (c, 0, 0)),   # gates_x chunk
            pl.BlockSpec((H, G), lambda c: (0, 0)),           # W_hh^T (f32)
            pl.BlockSpec((Bp, H), lambda c: (0, 0)),          # h0
            pl.BlockSpec((Bp, H), lambda c: (0, 0)),          # c0
        ],
        out_specs=[
            pl.BlockSpec((tc, Bp, H), lambda c: (c, 0, 0)),
            pl.BlockSpec((Bp, H), lambda c: (0, 0)),
            pl.BlockSpec((Bp, H), lambda c: (0, 0)),
        ],
        scratch_shapes=[
            pltpu.VMEM((Bp, H), jnp.float32),  # h state
            pltpu.VMEM((Bp, H), jnp.float32),  # c state
        ],
    )
    o_tbh, h_n, c_n = pl.pallas_call(
        kernel,
        out_shape=out_shapes,
        grid_spec=grid_spec,
        compiler_params=pltpu.CompilerParams(
            dimension_semantics=("arbitrary",)),  # sequential recurrence
    )(gates_x_tbg, w_hh_h4h, h0_bh, c0_bh)
    return o_tbh[:T, :B], h_n[:B], c_n[:B]


def decoder_forward(o_mh, w_dec_hv_bf16, b_dec_v, *, max_tile=512):
    """Linear(H, V) + log_softmax, batched over rows, 'parallel' grid."""
    M, H = o_mh.shape
    V = w_dec_hv_bf16.shape[-1]
    mt = _pick_row_tile(M, max_tile)
    m_pad = _round_up(M, mt)
    if m_pad != M:
        o_mh = jnp.pad(o_mh, ((0, m_pad - M), (0, 0)))
    logp = pl.pallas_call(
        _decoder_kernel,
        out_shape=jax.ShapeDtypeStruct((m_pad, V), jnp.float32),
        grid_spec=pltpu.PrefetchScalarGridSpec(
            num_scalar_prefetch=0,
            grid=(m_pad // mt,),
            in_specs=[
                pl.BlockSpec((mt, H), lambda i: (i, 0)),
                pl.BlockSpec((H, V), lambda i: (0, 0)),
                pl.BlockSpec((1, V), lambda i: (0, 0)),
            ],
            out_specs=pl.BlockSpec((mt, V), lambda i: (i, 0)),
        ),
        compiler_params=pltpu.CompilerParams(
            dimension_semantics=("parallel",)),
    )(o_mh, w_dec_hv_bf16, b_dec_v)
    return logp[:M]


def language_model_forward(params, x_ids_bt, h0):
    """Equivalent of LanguageModel.forward(x, h0) -> (log_probs, (h_n, c_n))."""
    h0_lbh, c0_lbh = h0
    B, T = x_ids_bt.shape
    H = h0_lbh.shape[-1]
    V = params["w_dec_t"].shape[-1]
    E = params["embedding"].shape[-1]

    # Glue: embedding gather directly in time-major (transpose only the tiny
    # int32 id matrix -> no (B,T,E) activation transpose in HBM).
    x_emb_tbe = jnp.take(params["embedding"], x_ids_bt.T, axis=0)  # [T, B, E]

    # 1) Hoisted input projection: one big bf16 MXU matmul over all T*B rows.
    gates_x = input_projection(x_emb_tbe.reshape(T * B, E),
                               params["w_ih_t"], params["bias"])
    gates_x_tbg = gates_x.reshape(T, B, 4 * H)

    # 2) Chunked-time LSTM recurrence (only h @ W_hh^T per step).
    o_tbh, h_n, c_n = lstm_forward(gates_x_tbg, params["w_hh_t"],
                                   h0_lbh[0], c0_lbh[0], hidden=H)

    # 3) Small H-wide transpose to batch-first BEFORE the decoder, so the
    #    (B*T, V) log-prob output is already in final order (no V-wide
    #    transpose / extra HBM round trip after the decoder).
    o_bth = jnp.transpose(o_tbh, (1, 0, 2))                   # [B, T, H]
    logp_mv = decoder_forward(o_bth.reshape(B * T, H),
                              params["w_dec_t"], params["b_dec"])
    logp_btv = logp_mv.reshape(B, T, V)
    return logp_btv, (h_n[None], c_n[None])


# ----------------------------------------------------------------------------
# Pure-JAX reference (mirrors the bf16-matmul / f32-accumulate precision of
# the kernels so the tolerance check validates the Pallas path, not the
# intentional bf16 quantization of the weights).
# ----------------------------------------------------------------------------
def reference_forward(params, x_ids_bt, h0):
    h0_lbh, c0_lbh = h0
    H = h0_lbh.shape[-1]
    emb = params["embedding"]
    x_emb_tbe = jnp.take(emb, x_ids_bt.T, axis=0)              # [T, B, E]

    gates_x = (jnp.dot(x_emb_tbe.astype(jnp.bfloat16), params["w_ih_t"],
                       preferred_element_type=jnp.float32)
               + params["bias"])                                # [T, B, 4H]

    def step(carry, g_x):
        h, c = carry
        gates = g_x + h @ params["w_hh_t"]
        i = jax.nn.sigmoid(gates[:, 0 * H:1 * H])
        f = jax.nn.sigmoid(gates[:, 1 * H:2 * H])
        g = jnp.tanh(gates[:, 2 * H:3 * H])
        o = jax.nn.sigmoid(gates[:, 3 * H:4 * H])
        c_new = f * c + i * g
        h_new = o * jnp.tanh(c_new)
        return (h_new, c_new), h_new

    (h_n, c_n), o_tbh = jax.lax.scan(step, (h0_lbh[0], c0_lbh[0]), gates_x)
    logits = (jnp.dot(o_tbh.astype(jnp.bfloat16), params["w_dec_t"],
                      preferred_element_type=jnp.float32)
              + params["b_dec"])
    logp = jax.nn.log_softmax(logits, axis=-1)
    return jnp.transpose(logp, (1, 0, 2)), (h_n[None], c_n[None])


# ----------------------------------------------------------------------------
# Main
# ----------------------------------------------------------------------------
if __name__ == "__main__":
    # H chosen as a multiple of 128 so gate slices / stores are lane-aligned.
    B, T, E, H, V = 2, 8, 64, 128, 256

    key = jax.random.PRNGKey(0)
    keys = jax.random.split(key, 8)
    scale = 0.1
    params = {
        "embedding": scale * jax.random.normal(keys[0], (V, E), jnp.float32),
        # LSTM weights pre-transposed; matmul weights stored bf16 (MXU-native),
        # recurrent weight kept f32 (numerical safety of the recurrence).
        "w_ih_t": (scale * jax.random.normal(keys[1], (E, 4 * H), jnp.float32)
                   ).astype(jnp.bfloat16),
        "w_hh_t": scale * jax.random.normal(keys[2], (H, 4 * H), jnp.float32),
        # combined bias b_ih + b_hh, 2D for lane-friendly broadcast (f32)
        "bias": scale * jax.random.normal(keys[3], (1, 4 * H), jnp.float32),
        # decoder Linear(H, V): W^T [H, V] bf16, bias [1, V] f32
        "w_dec_t": (scale * jax.random.normal(keys[4], (H, V), jnp.float32)
                    ).astype(jnp.bfloat16),
        "b_dec": scale * jax.random.normal(keys[5], (1, V), jnp.float32),
    }

    x_ids = jax.random.randint(keys[6], (B, T), 0, V, dtype=jnp.int32)
    h0 = (jnp.zeros((1, B, H), jnp.float32), jnp.zeros((1, B, H), jnp.float32))

    logp, (h_n, c_n) = language_model_forward(params, x_ids, h0)
    jax.block_until_ready((logp, h_n, c_n))

    # sanity-check against pure-JAX reference (same bf16 matmul precision)
    logp_ref, (h_ref, c_ref) = reference_forward(params, x_ids, h0)
    np.testing.assert_allclose(np.asarray(logp), np.asarray(logp_ref),
                               atol=2e-4, rtol=2e-4)
    np.testing.assert_allclose(np.asarray(h_n), np.asarray(h_ref),
                               atol=2e-4, rtol=2e-4)
    np.testing.assert_allclose(np.asarray(c_n), np.asarray(c_ref),
                               atol=2e-4, rtol=2e-4)

    assert logp.shape == (B, T, V) and h_n.shape == (1, B, H)
    print("KERNEL_OK")
</pallas_src>

<mosaic_0001>
module attributes {stable_mosaic.version = 11 : i64} {
  func.func @_input_proj_kernel(%arg0: i32, %arg1: memref<16x64xf32, #tpu.memory_space<vmem>>, %arg2: memref<64x512xbf16, #tpu.memory_space<vmem>>, %arg3: memref<1x512xf32, #tpu.memory_space<vmem>>, %arg4: memref<16x512xf32, #tpu.memory_space<vmem>>) attributes {dimension_semantics = [#tpu.dimension_semantics<parallel>], iteration_bounds = array<i64: 1>, scalar_prefetch = 0 : i64, scratch_operands = 0 : i64, tpu.core_type = #tpu.core_type<tc>, window_params = [{transform_indices = @transform_0, window_bounds = array<i64: 16, 64>}, {pipeline_mode = #tpu.pipeline_mode<synchronous>, transform_indices = @transform_1, window_bounds = array<i64: 64, 512>}, {pipeline_mode = #tpu.pipeline_mode<synchronous>, transform_indices = @transform_2, window_bounds = array<i64: 1, 512>}, {transform_indices = @transform_3, window_bounds = array<i64: 16, 512>}]} {
    %c0 = arith.constant 0 : index
    %c0_0 = arith.constant 0 : index
    %0 = vector.load %arg1[%c0, %c0_0] : memref<16x64xf32, #tpu.memory_space<vmem>>, vector<16x64xf32>
    %1 = arith.truncf %0 : vector<16x64xf32> to vector<16x64xbf16>
    %c0_1 = arith.constant 0 : index
    %c0_2 = arith.constant 0 : index
    %2 = vector.load %arg2[%c0_1, %c0_2] : memref<64x512xbf16, #tpu.memory_space<vmem>>, vector<64x512xbf16>
    %cst = arith.constant dense<0.000000e+00> : vector<16x512xf32>
    %3 = tpu.matmul %1, %2, %cst {dimension_numbers = #tpu.dot_dimension_numbers<[1], [0], [0], [1], [0, 0, 1, 1], [], []>} : vector<16x64xbf16>, vector<64x512xbf16>, vector<16x512xf32> -> vector<16x512xf32>
    %c0_3 = arith.constant 0 : index
    %c0_4 = arith.constant 0 : index
    %4 = vector.load %arg3[%c0_3, %c0_4] : memref<1x512xf32, #tpu.memory_space<vmem>>, vector<1x512xf32>
    %5 = vector.broadcast %4 : vector<1x512xf32> to vector<16x512xf32>
    %6 = arith.addf %3, %5 : vector<16x512xf32>
    %c0_5 = arith.constant 0 : index
    %c0_6 = arith.constant 0 : index
    %7 = vector.load %arg4[%c0_5, %c0_6] : memref<16x512xf32, #tpu.memory_space<vmem>>, vector<16x512xf32>
    tpu.vector_store %arg4[%c0_5, %c0_6], %6 {strides = array<i32>} : memref<16x512xf32, #tpu.memory_space<vmem>>, vector<16x512xf32>,
    return
  }
  func.func @transform_0(%arg0: i32) -> (i32, i32) {
    %c0_i32 = arith.constant 0 : i32
    %c0_i32_0 = arith.constant 0 : i32
    return %arg0, %c0_i32 : i32, i32
  }
  func.func @transform_1(%arg0: i32) -> (i32, i32) {
    %c0_i32 = arith.constant 0 : i32
    %c0_i32_0 = arith.constant 0 : i32
    %c0_i32_1 = arith.constant 0 : i32
    return %c0_i32, %c0_i32_0 : i32, i32
  }
  func.func @transform_2(%arg0: i32) -> (i32, i32) {
    %c0_i32 = arith.constant 0 : i32
    %c0_i32_0 = arith.constant 0 : i32
    %c0_i32_1 = arith.constant 0 : i32
    return %c0_i32, %c0_i32_0 : i32, i32
  }
  func.func @transform_3(%arg0: i32) -> (i32, i32) {
    %c0_i32 = arith.constant 0 : i32
    %c0_i32_0 = arith.constant 0 : i32
    return %arg0, %c0_i32 : i32, i32
  }
}

</mosaic_0001>

<bundles_post_ra>
// kernel: tpu_custom_call.1
= control target key start
LH: loop header
LB: loop body
LE: loop exit
PB: predicated region body
PF: predicated region fallthrough
CT: control target
= control target key end

     0   :  { %8 = vsyncpa [#allocation3], 0  ;;  %s474_s0 = inlined_call_operand.hbm [shape: f32[16,64], index: 0, kind: input, shape index: {}]   ;;  %s475_s1 = inlined_call_operand.hbm [shape: bf16[64,512], index: 1, kind: input, shape index: {}]   ;;  %s476_s2 = inlined_call_operand.vmem [shape: f32[1,512], index: 2, kind: input, shape index: {}]   ;;  %s477_s3 = inlined_call_operand.hbm [shape: f32[16,512], index: 3, kind: output, shape index: {}]  }
   0x1   :  { %9 = vsyncpa [#allocation6], 0 }
   0x2   :  { %10 = vsyncpa [#allocation4], 0  ;;  %s405_s12 = smov [#allocation2]   ;;  %s333_s16 = scalar_lea.hbm %s474_s0, 256 }
   0x3   :  { %s16_s13 = sshll.u32 %s405_s12, 4  ;;  %p334_p0 = scmp.ne.s32.totalorder %s474_s0, %s333_s16  ;;  %s17_s13 = int_to_ptr.vmem [resolvable:$true] %s16_s13 }
   0x4   :  { %p337_p1 = scmp.lt.u32.totalorder %s333_s16, %s474_s0 }
   0x6   :  { %p339_p2 = pnand %p337_p1, %p334_p0 }
   0x8   :  { %342 = shalt.err (!%p339_p2)
}
   0x9   :  { %s343_s21 = scalar_lea.vmem %s17_s13, 256  ;;  %p348_p4 = scmp.lt.s32.totalorder %s17_s13, %s17_s13 }
   0xa   :  { %p344_p3 = scmp.ne.s32.totalorder %s17_s13, %s343_s21  ;;  %p349_p5 = scmp.lt.s32.totalorder %s343_s21, %s343_s21 }
   0xc   :  { %p350_p6 = por %p349_p5, %p348_p4 }
   0xe   :  { %p351_p7 = pnand %p350_p6, %p344_p3 }
  0x10   :  { %354 = shalt.err (!%p351_p7)
}
  0x11   :  { %s406_s22 = smov 128   ;;  %s407_s23 = smov 8  }
  0x12   :  { %22 = dma.hbm_to_vmem [thread:$0]  %s474_s0, 256, %s17_s13, [#allocation3], %s406_s22, %s406_s22, %s407_s23  }
  0x13   :  { %s408_s26 = smov [#allocation5]   ;;  %s355_s30 = scalar_lea.hbm %s475_s1, 2048 }
  0x14   :  { %s28_s27 = sshll.u32 %s408_s26, 4  ;;  %p356_p8 = scmp.ne.s32.totalorder %s475_s1, %s355_s30  ;;  %s29_s27 = int_to_ptr.vmem [resolvable:$true] %s28_s27 }
  0x15   :  { %p359_p9 = scmp.lt.u32.totalorder %s355_s30, %s475_s1 }
  0x17   :  { %p361_p10 = pnand %p359_p9, %p356_p8 }
  0x19   :  { %364 = shalt.err (!%p361_p10)
}
  0x1a   :  { %s365_s8 = scalar_lea.vmem %s29_s27, 2048  ;;  %p370_p12 = scmp.lt.s32.totalorder %s29_s27, %s29_s27 }
  0x1b   :  { %p366_p11 = scmp.ne.s32.totalorder %s29_s27, %s365_s8  ;;  %p371_p13 = scmp.lt.s32.totalorder %s365_s8, %s365_s8 }
  0x1d   :  { %p372_p0 = por %p371_p13, %p370_p12 }
  0x1f   :  { %p373_p1 = pnand %p372_p0, %p366_p11 }
  0x21   :  { %376 = shalt.err (!%p373_p1)
}
  0x22   :  { %s409_s0 = smov 256   ;;  %s410_s9 = smov 16  }
  0x23   :  { %34 = dma.hbm_to_vmem [thread:$0]  %s475_s1, 2048, %s29_s27, [#allocation6], %s409_s0, %s409_s0, %s410_s9  }
  0x24   :  { %399 = dma.done.wait [#allocation3], 256  }
  0x25   :  { %400 = vsyncadd [#allocation3], 4294967040 }
  0x26   :  { %401 = dma.done.wait [#allocation6], 2048  }
  0x27   :  { %402 = vsyncadd [#allocation6], 4294965248  ;;  %v411_v0 = vmov 0   ;;  %v309_v1 = vld [vmem:[#allocation5 + $0x4] ss:$16 sps:$4 sm:$0xff]   ;;  %v45_v18 = vld [vmem:[#allocation2 + $0x8] sm:$0xff]  ;;  %v65_v20 = vlaneseq }
  0x28   :  { %201 = vmatprep.mubr.bf16.mxu0 %v411_v0  ;;  %244 = vmatprep.mubr.bf16.mxu1 %v411_v0  ;;  %v311_v2 = vld [vmem:[#allocation5 + $0xc] ss:$16 sps:$4 sm:$0xff]   ;;  %v313_v3 = vld [vmem:[#allocation5] ss:$16 sps:$4 sm:$0xff]   ;;  %v314_v4 = vld [vmem:[#allocation5 + $0x8] ss:$16 sps:$4 sm:$0xff]  }
  0x29   :  { %169 = vmatprep.subr.bf16.mxu0 %v309_v1  ;;  %212 = vmatprep.subr.bf16.mxu1 %v311_v2  ;;  %v315_v5 = vld [vmem:[#allocation5 + $0x24] ss:$16 sps:$4 sm:$0xff]   ;;  %v317_v6 = vld [vmem:[#allocation5 + $0x2c] ss:$16 sps:$4 sm:$0xff]   ;;  %v319_v7 = vld [vmem:[#allocation5 + $0x20] ss:$16 sps:$4 sm:$0xff]  }
  0x2a   :  { %170 = vmatpush1.bf16.msra.mxu0 %v313_v3  ;;  %213 = vmatpush1.bf16.msra.mxu1 %v314_v4  ;;  %v320_v8 = vld [vmem:[#allocation5 + $0x28] ss:$16 sps:$4 sm:$0xff]   ;;  %v321_v9 = vld [vmem:[#allocation5 + $0x44] ss:$16 sps:$4 sm:$0xff]   ;;  %v323_v10 = vld [vmem:[#allocation5 + $0x4c] ss:$16 sps:$4 sm:$0xff]  }
  0x2b   :  { %171 = vmatprep.subr.bf16.mxu0 %v315_v5  ;;  %214 = vmatprep.subr.bf16.mxu1 %v317_v6  ;;  %v325_v11 = vld [vmem:[#allocation5 + $0x40] ss:$16 sps:$4 sm:$0xff]   ;;  %v326_v12 = vld [vmem:[#allocation5 + $0x48] ss:$16 sps:$4 sm:$0xff]   ;;  %v327_v13 = vld [vmem:[#allocation5 + $0x64] ss:$16 sps:$4 sm:$0xff]  }
  0x2c   :  { %v329_v14 = vld [vmem:[#allocation5 + $0x6c] ss:$16 sps:$4 sm:$0xff]   ;;  %v331_v15 = vld [vmem:[#allocation5 + $0x60] ss:$16 sps:$4 sm:$0xff]   ;;  %v332_v16 = vld [vmem:[#allocation5 + $0x68] ss:$16 sps:$4 sm:$0xff]  }
  0x2d   :  { %v44_v17 = vld [vmem:[#allocation2] sm:$0xff]  ;;  %vm165_vm0 = vcmask 523264   ;;  %v66_v21 = vshrl.u32 %v65_v20, 7  ;;  %s412_s13 = smov [#allocation7]  }
  0x2e   :  { %172 = vmatpush1.bf16.msra.mxu0 %v319_v7  ;;  %215 = vmatpush1.bf16.msra.mxu1 %v320_v8  ;;  %v46_v19 = vpack.c.bf16 %v45_v18, %v44_v17  ;;  %v63_v24 = vld [vmem:[%s476_s2] sm:$0xf]  ;;  %s268_s14 = sshll.u32 %s412_s13, 4  ;;  %s269_s14 = int_to_ptr.vmem [resolvable:$true] %s268_s14 }
  0x2f   :  { %173 = vmatprep.subr.bf16.mxu0 %v321_v9  ;;  %216 = vmatprep.subr.bf16.mxu1 %v323_v10  ;;  %v67_v22 = vsub.s32 0, %v66_v21  ;;  %v75_v23 = vsub.s32 2, %v66_v21  ;;  %v71_v25 = vsub.s32 1, %v66_v21  ;;  %v79_v26 = vsub.s32 3, %v66_v21  ;;  %s377_s2 = scalar_lea.vmem %s269_s14, 1024  ;;  %p382_p3 = scmp.lt.s32.totalorder %s269_s14, %s269_s14 }
  0x30   :  { %p378_p2 = scmp.ne.s32.totalorder %s269_s14, %s377_s2  ;;  %p383_p4 = scmp.lt.s32.totalorder %s377_s2, %s377_s2 }
  0x31   :  { %v68_v27 = vrot.slane %v63_v24, %v67_v22  ;;  %v76_v28 = vrot.slane %v63_v24, %v75_v23  ;;  %v72_v29 = vrot.slane %v63_v24, %v71_v25  ;;  %v80_v30 = vrot.slane %v63_v24, %v79_v26 }
  0x32   :  { %174 = vmatpush1.bf16.msra.mxu0 %v325_v11  ;;  %217 = vmatpush1.bf16.msra.mxu1 %v326_v12  ;;  %p384_p5 = por %p383_p4, %p382_p3 }
  0x33   :  { %175 = vmatprep.subr.bf16.mxu0 %v327_v13  ;;  %218 = vmatprep.subr.bf16.mxu1 %v329_v14 }
  0x34   :  { %p385_p6 = pnand %p384_p5, %p378_p2 }
  0x36   :  { %176 = vmatpush1.bf16.msra.mxu0 %v331_v15  ;;  %219 = vmatpush1.bf16.msra.mxu1 %v332_v16 }
  0x39   :  { %297 = vmatmul.mubr.msk.bf16.vlgmr.msra.gmra.mrb[0].mxu0 %vm165_vm0, %v46_v19  ;;  %298 = vmatmul.mubr.msk.bf16.vlgmr.msra.gmra.mrb[0].mxu1 %vm165_vm0, %v46_v19 }
 0x10c   :  { %v203_v31 = vpop.f32.mrb[0].mxu0  ;;  %v246_v32 = vpop.f32.mrb[0].mxu1 }
 0x10d   :  { %v204_v33 = vadd.f32 %v203_v31, %v68_v27  ;;  %v247_v34 = vadd.f32 %v246_v32, %v76_v28  ;;  %v205_v35 = vpop.f32.mrb[1].mxu0  ;;  %v248_v36 = vpop.f32.mrb[1].mxu1 }
 0x10e   :  { %v206_v37 = vadd.f32 %v205_v35, %v72_v29  ;;  %v249_v38 = vadd.f32 %v248_v36, %v80_v30  ;;  %v207_v39 = vpop.f32.mrb[2].mxu0  ;;  %v250_v40 = vpop.f32.mrb[2].mxu1 }
 0x10f   :  { %255 = vst [vmem:[#allocation7] sm:$0xff] %v204_v33  ;;  %257 = vst [vmem:[#allocation7 + $0x10] sm:$0xff] %v247_v34  ;;  %v208_v41 = vadd.f32 %v207_v39, %v68_v27  ;;  %v251_v42 = vadd.f32 %v250_v40, %v76_v28  ;;  %v209_v43 = vpop.f32.mrb[3].mxu0  ;;  %v252_v44 = vpop.f32.mrb[3].mxu1 }
 0x110   :  { %256 = vst [vmem:[#allocation7 + $0x8] sm:$0xff] %v206_v37  ;;  %258 = vst [vmem:[#allocation7 + $0x18] sm:$0xff] %v249_v38  ;;  %v210_v45 = vadd.f32 %v209_v43, %v72_v29  ;;  %v253_v46 = vadd.f32 %v252_v44, %v80_v30 }
 0x111   :  { %259 = vst [vmem:[#allocation7 + $0x20] sm:$0xff] %v208_v41  ;;  %261 = vst [vmem:[#allocation7 + $0x30] sm:$0xff] %v251_v42 }
 0x112   :  { %260 = vst [vmem:[#allocation7 + $0x28] sm:$0xff] %v210_v45  ;;  %262 = vst [vmem:[#allocation7 + $0x38] sm:$0xff] %v253_v46 }
 0x113   :  { %388 = shalt.err (!%p385_p6)
}
 0x114   :  { %s389_s17 = scalar_lea.hbm %s477_s3, 1024 }
 0x115   :  { %p390_p7 = scmp.ne.s32.totalorder %s477_s3, %s389_s17  ;;  %p393_p8 = scmp.lt.u32.totalorder %s389_s17, %s477_s3 }
 0x117   :  { %p395_p9 = pnand %p393_p8, %p390_p7 }
 0x119   :  { %398 = shalt.err (!%p395_p9)
}
 0x11a   :  { %s413_s22 = smov 512   ;;  %s414_s23 = smov 32  }
 0x11b   :  { %274 = dma.vmem_to_hbm [thread:$0]  %s269_s14, 1024, %s477_s3, [#allocation4], %s413_s22, %s413_s22, %s414_s23  }
 0x11c   :  { %403 = dma.done.wait [#allocation4], 1024  }
 0x11d   :  { %404 = vsyncadd [#allocation4], 4294966272 }
 0x11e   :  { %278 = vsyncpa [#allocation3], 1 }
 0x11f   :  { %279 = vsyncpa [#allocation6], 1 }
 0x120   :  { %280 = vsyncpa [#allocation4], 1 }

</bundles_post_ra>
